<compile_context>
chip_gen: v5e
topology: v5e:2x2
jax: 0.10.0
libtpu: 0.0.40
codegen_flags: <defaults>
</compile_context>

<pallas_src>
import functools

import jax
import jax.numpy as jnp
from jax.experimental import pallas as pl
from jax.experimental.pallas import tpu as pltpu

NEG_INF = -1e30  # f32-only masking value; softmax path is kept in f32.


def _gat_layer(y, adj, c):
    """One GATConv + skip-Linear layer from the fused projection y.

    y:   (N, 2c+3) f32, columns = [ h_src (c) | lin + bias (c) | s_dst | 1 | s_src ]
    adj: (N, N)    f32, adj[i, j] = #edges j -> i
    """
    h_src = y[:, :c]
    left = y[:, 2 * c:2 * c + 2]       # [ s_dst | 1 ]
    right = y[:, 2 * c + 1:2 * c + 3]  # [ 1 | s_src ]

    # e[i, j] = s_dst[i] + s_src[j] via one small (N,2)@(2,N)^T MXU push
    # (replaces the former M=1 s_src matmul + VPU broadcast add; no bare transpose).
    e = jax.lax.dot_general(left, right, (((1,), (1,)), ((), ())),
                            preferred_element_type=jnp.float32)
    e = jnp.where(e >= 0.0, e, 0.2 * e)        # LeakyReLU(0.2)
    e = jnp.where(adj > 0.0, e, NEG_INF)       # mask non-edges (keep f32)

    m = jnp.max(e, axis=-1, keepdims=True)
    p = jnp.exp(e - m) * adj                   # adj carries edge multiplicities
    denom = jnp.sum(p, axis=-1, keepdims=True)
    alpha = p / jnp.maximum(denom, 1e-20)      # exact; zero-in-degree rows -> alpha = 0

    # bf16 MXU operands, f32 accumulation.
    agg = jnp.dot(alpha.astype(jnp.bfloat16), h_src.astype(jnp.bfloat16),
                  preferred_element_type=jnp.float32)
    return agg + y[:, c:2 * c]                 # + (lin + b_conv + b_lin)


def _project(h_bf16, wcat_ref, rows):
    """Fused shared-LHS projection: h @ W_top + bias_row (bias via affine row)."""
    y = jnp.dot(h_bf16, wcat_ref[:rows, :], preferred_element_type=jnp.float32)
    return y + wcat_ref[rows:rows + 1, :].astype(jnp.float32)


def gat_kernel_identity(y1_ref, adj_ref, wcat2_ref, out_ref, *, hidden, out_ch):
    """x == I path: layer-1 fused projection fully hoisted (exact f32) into y1."""
    adj = adj_ref[...]
    h = jnp.maximum(_gat_layer(y1_ref[...], adj, hidden), 0.0)        # layer 1 + ReLU
    y2 = _project(h.astype(jnp.bfloat16), wcat2_ref, hidden)          # layer-2 projection
    out_ref[...] = _gat_layer(y2, adj, out_ch)                        # layer 2


def gat_kernel_generic(x_ref, wcat1_ref, adj_ref, wcat2_ref, out_ref,
                       *, f_in, hidden, out_ch):
    """Generic path: layer-1 fused projection done in-kernel on the MXU."""
    adj = adj_ref[...]
    y1 = _project(x_ref[...], wcat1_ref, f_in)                        # layer-1 projection
    h = jnp.maximum(_gat_layer(y1, adj, hidden), 0.0)                 # layer 1 + ReLU
    y2 = _project(h.astype(jnp.bfloat16), wcat2_ref, hidden)          # layer-2 projection
    out_ref[...] = _gat_layer(y2, adj, out_ch)                        # layer 2


def _fuse_layer_params(w_src, w_dst, a_src, a_dst, b_conv, w_lin, b_lin):
    """Exact f32 algebraic refactor of one layer's params.

    Returns:
      w_top    (F, 2c+3): [ W_src | W_lin | v_dst | 0 | v_src ]
      bias_row (1, 2c+3): [   0   | b_conv+b_lin |  0 | 1 | 0 ]
    so that  x_aug @ [w_top; bias_row] = [h_src | lin+bias | s_dst | 1 | s_src].
    """
    c = w_src.shape[1]
    v_dst = w_dst @ a_dst.T                                   # (F, 1)
    v_src = w_src @ a_src.T                                   # (F, 1)
    w_top = jnp.concatenate(
        [w_src, w_lin, v_dst, jnp.zeros_like(v_dst), v_src], axis=1)
    bias_row = jnp.concatenate(
        [jnp.zeros((1, c), jnp.float32), b_conv + b_lin,
         jnp.zeros((1, 1), jnp.float32), jnp.ones((1, 1), jnp.float32),
         jnp.zeros((1, 1), jnp.float32)], axis=1)
    return w_top, bias_row


def gat_forward(x, edge_index, params, out_channels, *, x_is_identity=False):
    """Glue: edge_index -> dense adjacency, algebraic refactors, one pallas_call."""
    n, f_in = x.shape
    hidden = params["w1_src"].shape[1]

    src, dst = edge_index[0], edge_index[1]
    adj = jnp.zeros((n, n), jnp.float32).at[dst, src].add(1.0)

    w_top1, brow1 = _fuse_layer_params(params["w1_src"], params["w1_dst"],
                                       params["a1_src"], params["a1_dst"],
                                       params["b1"], params["wl1"], params["bl1"])
    w_top2, brow2 = _fuse_layer_params(params["w2_src"], params["w2_dst"],
                                       params["a2_src"], params["a2_dst"],
                                       params["b2"], params["wl2"], params["bl2"])
    # Layer-2 fused weights (+ affine bias row) as bf16 MXU operand (f32 accumulate).
    w_cat2 = jnp.concatenate([w_top2, brow2], axis=0).astype(jnp.bfloat16)  # (H+1, 2C+3)

    vmem = pl.BlockSpec(memory_space=pltpu.MemorySpace.VMEM)

    if x_is_identity:
        if f_in != n:
            raise ValueError("x_is_identity=True requires a square identity feature "
                             "matrix (got shape %s)" % str(x.shape))
        # x = I (as in the original script: x = np.identity(num_doc)):
        # I @ w_top1 + bias_row == w_top1 + bias_row  -> no layer-1 matmul at all.
        y1 = w_top1 + brow1                                             # (N, 2H+3) f32
        kernel = functools.partial(gat_kernel_identity,
                                   hidden=hidden, out_ch=out_channels)
        args = (y1, adj, w_cat2)                                        # 3 inputs
    else:
        w_cat1 = jnp.concatenate([w_top1, brow1], axis=0).astype(jnp.bfloat16)
        kernel = functools.partial(gat_kernel_generic, f_in=f_in,
                                   hidden=hidden, out_ch=out_channels)
        args = (x.astype(jnp.bfloat16), w_cat1, adj, w_cat2)            # 4 inputs

    return pl.pallas_call(
        kernel,
        out_shape=jax.ShapeDtypeStruct((n, out_channels), jnp.float32),
        in_specs=[vmem] * len(args),
        out_specs=vmem,
    )(*args)


def gat_reference(x, edge_index, params):
    """Pure-JAX f32 reference (original, unfused math) for a correctness check."""
    n = x.shape[0]
    adj = jnp.zeros((n, n), jnp.float32).at[edge_index[1], edge_index[0]].add(1.0)

    def layer(h_in, ws, wd, asrc, adst, b):
        hs = h_in @ ws
        hd = h_in @ wd
        s_src = hs @ asrc[0]
        s_dst = hd @ adst[0]
        e = s_dst[:, None] + s_src[None, :]
        e = jnp.where(e >= 0, e, 0.2 * e)
        e = jnp.where(adj > 0, e, NEG_INF)
        m = jnp.max(e, axis=-1, keepdims=True)
        p = jnp.exp(e - m) * adj
        denom = jnp.sum(p, axis=-1, keepdims=True)
        alpha = p / jnp.maximum(denom, 1e-20)
        return alpha @ hs + b

    h = layer(x, params["w1_src"], params["w1_dst"], params["a1_src"], params["a1_dst"], params["b1"])
    h = h + x @ params["wl1"] + params["bl1"]
    h = jnp.maximum(h, 0.0)
    y = layer(h, params["w2_src"], params["w2_dst"], params["a2_src"], params["a2_dst"], params["b2"])
    y = y + h @ params["wl2"] + params["bl2"]
    return y


def init_params(key, f_in, hidden, out):
    """Deterministic glorot-style init; shapes implied by GAT.__init__ (heads=1)."""
    ks = jax.random.split(key, 10)

    def glorot(k, shape):
        fan_in, fan_out = shape
        s = jnp.sqrt(2.0 / (fan_in + fan_out)).astype(jnp.float32)
        return (s * jax.random.normal(k, shape)).astype(jnp.float32)

    return dict(
        # conv1: GATConv((-1, -1), hidden)
        w1_src=glorot(ks[0], (f_in, hidden)),
        w1_dst=glorot(ks[1], (f_in, hidden)),
        a1_src=glorot(ks[2], (1, hidden)),
        a1_dst=glorot(ks[3], (1, hidden)),
        b1=jnp.zeros((1, hidden), jnp.float32),
        # lin1: Linear(-1, hidden)
        wl1=glorot(ks[4], (f_in, hidden)),
        bl1=jnp.zeros((1, hidden), jnp.float32),
        # conv2: GATConv((-1, -1), out)
        w2_src=glorot(ks[5], (hidden, out)),
        w2_dst=glorot(ks[6], (hidden, out)),
        a2_src=glorot(ks[7], (1, out)),
        a2_dst=glorot(ks[8], (1, out)),
        b2=jnp.zeros((1, out), jnp.float32),
        # lin2: Linear(-1, out)
        wl2=glorot(ks[9], (hidden, out)),
        bl2=jnp.zeros((1, out), jnp.float32),
    )


if __name__ == "__main__":
    N = 64          # num_doc: x = np.identity(num_doc) -> F_in == N
    F_IN = 64
    HIDDEN = 32     # hidden_channels
    OUT = 8         # out_channels
    E = 256         # number of directed edges

    key = jax.random.PRNGKey(0)
    k_src, k_dst, k_params, k_x = jax.random.split(key, 4)

    x_id = jnp.eye(N, F_IN, dtype=jnp.float32)               # mirrors x = np.identity(num_doc)
    src = jax.random.randint(k_src, (E,), 0, N)
    dst = jax.random.randint(k_dst, (E,), 0, N)
    edge_index = jnp.stack([src, dst]).astype(jnp.int32)      # (2, E) like PyG edge_index

    params = init_params(k_params, F_IN, HIDDEN, OUT)

    # --- identity-feature path (the original script's case) ---
    out = gat_forward(x_id, edge_index, params, OUT, x_is_identity=True)
    out = jax.block_until_ready(out)
    ref = gat_reference(x_id, edge_index, params)
    assert out.shape == (N, OUT)
    assert bool(jnp.all(jnp.isfinite(out)))
    # bf16 MXU operands => slightly looser tolerance than pure f32.
    assert bool(jnp.allclose(out, ref, atol=1e-2, rtol=1e-2)), \
        float(jnp.max(jnp.abs(out - ref)))

    # --- generic-feature path (in-kernel fused layer-1 projection) ---
    x_gen = jax.random.normal(k_x, (N, F_IN), jnp.float32)
    out_g = gat_forward(x_gen, edge_index, params, OUT, x_is_identity=False)
    out_g = jax.block_until_ready(out_g)
    ref_g = gat_reference(x_gen, edge_index, params)
    assert bool(jnp.all(jnp.isfinite(out_g)))
    # x and layer-1 weights are bf16 MXU operands here => looser tolerance.
    assert bool(jnp.allclose(out_g, ref_g, atol=5e-2, rtol=5e-2)), \
        float(jnp.max(jnp.abs(out_g - ref_g)))

    print("KERNEL_OK")
</pallas_src>

<mosaic_0001>
module attributes {stable_mosaic.version = 11 : i64} {
  func.func @gat_kernel_identity(%arg0: memref<64x67xf32, #tpu.memory_space<vmem>>, %arg1: memref<64x64xf32, #tpu.memory_space<vmem>>, %arg2: memref<33x19xbf16, #tpu.memory_space<vmem>>, %arg3: memref<64x8xf32, #tpu.memory_space<vmem>>) attributes {dimension_semantics = [], scalar_prefetch = 0 : i64, scratch_operands = 0 : i64, tpu.core_type = #tpu.core_type<tc>} {
    %c0 = arith.constant 0 : index
    %c0_0 = arith.constant 0 : index
    %0 = vector.load %arg1[%c0, %c0_0] : memref<64x64xf32, #tpu.memory_space<vmem>>, vector<64x64xf32>
    %c0_1 = arith.constant 0 : index
    %c0_2 = arith.constant 0 : index
    %1 = vector.load %arg0[%c0_1, %c0_2] : memref<64x67xf32, #tpu.memory_space<vmem>>, vector<64x67xf32>
    %2 = vector.extract_strided_slice %1 {offsets = [0, 0], sizes = [64, 32], strides = [1, 1]} : vector<64x67xf32> to vector<64x32xf32>
    %3 = vector.extract_strided_slice %1 {offsets = [0, 64], sizes = [64, 2], strides = [1, 1]} : vector<64x67xf32> to vector<64x2xf32>
    %4 = vector.extract_strided_slice %1 {offsets = [0, 65], sizes = [64, 2], strides = [1, 1]} : vector<64x67xf32> to vector<64x2xf32>
    %cst = arith.constant dense<0.000000e+00> : vector<64x64xf32>
    %5 = tpu.matmul %3, %4, %cst {dimension_numbers = #tpu.dot_dimension_numbers<[1], [1], [0], [0], [0, 0, 1, 0], [], []>} : vector<64x2xf32>, vector<64x2xf32>, vector<64x64xf32> -> vector<64x64xf32>
    %cst_3 = arith.constant 0.000000e+00 : f32
    %6 = vector.broadcast %cst_3 : f32 to vector<64x64xf32>
    %7 = arith.cmpf oge, %5, %6 : vector<64x64xf32>
    %cst_4 = arith.constant 2.000000e-01 : f32
    %8 = vector.broadcast %cst_4 : f32 to vector<64x64xf32>
    %9 = arith.mulf %8, %5 : vector<64x64xf32>
    %10 = arith.select %7, %5, %9 : vector<64x64xi1>, vector<64x64xf32>
    %cst_5 = arith.constant 0.000000e+00 : f32
    %11 = vector.broadcast %cst_5 : f32 to vector<64x64xf32>
    %12 = arith.cmpf ogt, %0, %11 : vector<64x64xf32>
    %cst_6 = arith.constant -1.000000e+30 : f32
    %13 = vector.broadcast %cst_6 : f32 to vector<64x64xf32>
    %14 = arith.select %12, %10, %13 : vector<64x64xi1>, vector<64x64xf32>
    %cst_7 = arith.constant dense<0xFF800000> : vector<64xf32>
    %15 = vector.multi_reduction <maximumf>, %14, %cst_7 [1] : vector<64x64xf32> to vector<64xf32>
    %16 = vector.shape_cast %15 : vector<64xf32> to vector<64x1xf32>
    %17 = vector.broadcast %16 : vector<64x1xf32> to vector<64x64xf32>
    %18 = arith.subf %14, %17 : vector<64x64xf32>
    %19 = math.exp %18 : vector<64x64xf32>
    %20 = arith.mulf %19, %0 : vector<64x64xf32>
    %cst_8 = arith.constant dense<0.000000e+00> : vector<64xf32>
    %21 = vector.multi_reduction <add>, %20, %cst_8 [1] : vector<64x64xf32> to vector<64xf32>
    %22 = vector.shape_cast %21 : vector<64xf32> to vector<64x1xf32>
    %cst_9 = arith.constant 9.99999968E-21 : f32
    %23 = vector.broadcast %cst_9 : f32 to vector<64x1xf32>
    %24 = arith.maximumf %22, %23 : vector<64x1xf32>
    %25 = vector.broadcast %24 : vector<64x1xf32> to vector<64x64xf32>
    %26 = arith.divf %20, %25 : vector<64x64xf32>
    %27 = arith.truncf %26 : vector<64x64xf32> to vector<64x64xbf16>
    %28 = arith.truncf %2 : vector<64x32xf32> to vector<64x32xbf16>
    %cst_10 = arith.constant dense<0.000000e+00> : vector<64x32xf32>
    %29 = tpu.matmul %27, %28, %cst_10 {dimension_numbers = #tpu.dot_dimension_numbers<[1], [0], [0], [1], [0, 0, 1, 1], [], []>} : vector<64x64xbf16>, vector<64x32xbf16>, vector<64x32xf32> -> vector<64x32xf32>
    %30 = vector.extract_strided_slice %1 {offsets = [0, 32], sizes = [64, 32], strides = [1, 1]} : vector<64x67xf32> to vector<64x32xf32>
    %31 = arith.addf %29, %30 : vector<64x32xf32>
    %cst_11 = arith.constant 0.000000e+00 : f32
    %32 = vector.broadcast %cst_11 : f32 to vector<64x32xf32>
    %33 = arith.maximumf %31, %32 : vector<64x32xf32>
    %34 = arith.truncf %33 : vector<64x32xf32> to vector<64x32xbf16>
    %c0_12 = arith.constant 0 : index
    %c0_13 = arith.constant 0 : index
    %35 = vector.load %arg2[%c0_12, %c0_13] : memref<33x19xbf16, #tpu.memory_space<vmem>>, vector<32x19xbf16>
    %cst_14 = arith.constant dense<0.000000e+00> : vector<64x19xf32>
    %36 = tpu.matmul %34, %35, %cst_14 {dimension_numbers = #tpu.dot_dimension_numbers<[1], [0], [0], [1], [0, 0, 1, 1], [], []>} : vector<64x32xbf16>, vector<32x19xbf16>, vector<64x19xf32> -> vector<64x19xf32>
    %c32 = arith.constant 32 : index
    %c0_15 = arith.constant 0 : index
    %37 = vector.load %arg2[%c32, %c0_15] : memref<33x19xbf16, #tpu.memory_space<vmem>>, vector<1x19xbf16>
    %38 = arith.extf %37 : vector<1x19xbf16> to vector<1x19xf32>
    %39 = vector.broadcast %38 : vector<1x19xf32> to vector<64x19xf32>
    %40 = arith.addf %36, %39 : vector<64x19xf32>
    %41 = vector.extract_strided_slice %40 {offsets = [0, 0], sizes = [64, 8], strides = [1, 1]} : vector<64x19xf32> to vector<64x8xf32>
    %42 = vector.extract_strided_slice %40 {offsets = [0, 16], sizes = [64, 2], strides = [1, 1]} : vector<64x19xf32> to vector<64x2xf32>
    %43 = vector.extract_strided_slice %40 {offsets = [0, 17], sizes = [64, 2], strides = [1, 1]} : vector<64x19xf32> to vector<64x2xf32>
    %cst_16 = arith.constant dense<0.000000e+00> : vector<64x64xf32>
    %44 = tpu.matmul %42, %43, %cst_16 {dimension_numbers = #tpu.dot_dimension_numbers<[1], [1], [0], [0], [0, 0, 1, 0], [], []>} : vector<64x2xf32>, vector<64x2xf32>, vector<64x64xf32> -> vector<64x64xf32>
    %cst_17 = arith.constant 0.000000e+00 : f32
    %45 = vector.broadcast %cst_17 : f32 to vector<64x64xf32>
    %46 = arith.cmpf oge, %44, %45 : vector<64x64xf32>
    %cst_18 = arith.constant 2.000000e-01 : f32
    %47 = vector.broadcast %cst_18 : f32 to vector<64x64xf32>
    %48 = arith.mulf %47, %44 : vector<64x64xf32>
    %49 = arith.select %46, %44, %48 : vector<64x64xi1>, vector<64x64xf32>
    %cst_19 = arith.constant 0.000000e+00 : f32
    %50 = vector.broadcast %cst_19 : f32 to vector<64x64xf32>
    %51 = arith.cmpf ogt, %0, %50 : vector<64x64xf32>
    %cst_20 = arith.constant -1.000000e+30 : f32
    %52 = vector.broadcast %cst_20 : f32 to vector<64x64xf32>
    %53 = arith.select %51, %49, %52 : vector<64x64xi1>, vector<64x64xf32>
    %cst_21 = arith.constant dense<0xFF800000> : vector<64xf32>
    %54 = vector.multi_reduction <maximumf>, %53, %cst_21 [1] : vector<64x64xf32> to vector<64xf32>
    %55 = vector.shape_cast %54 : vector<64xf32> to vector<64x1xf32>
    %56 = vector.broadcast %55 : vector<64x1xf32> to vector<64x64xf32>
    %57 = arith.subf %53, %56 : vector<64x64xf32>
    %58 = math.exp %57 : vector<64x64xf32>
    %59 = arith.mulf %58, %0 : vector<64x64xf32>
    %cst_22 = arith.constant dense<0.000000e+00> : vector<64xf32>
    %60 = vector.multi_reduction <add>, %59, %cst_22 [1] : vector<64x64xf32> to vector<64xf32>
    %61 = vector.shape_cast %60 : vector<64xf32> to vector<64x1xf32>
    %cst_23 = arith.constant 9.99999968E-21 : f32
    %62 = vector.broadcast %cst_23 : f32 to vector<64x1xf32>
    %63 = arith.maximumf %61, %62 : vector<64x1xf32>
    %64 = vector.broadcast %63 : vector<64x1xf32> to vector<64x64xf32>
    %65 = arith.divf %59, %64 : vector<64x64xf32>
    %66 = arith.truncf %65 : vector<64x64xf32> to vector<64x64xbf16>
    %67 = arith.truncf %41 : vector<64x8xf32> to vector<64x8xbf16>
    %cst_24 = arith.constant dense<0.000000e+00> : vector<64x8xf32>
    %68 = tpu.matmul %66, %67, %cst_24 {dimension_numbers = #tpu.dot_dimension_numbers<[1], [0], [0], [1], [0, 0, 1, 1], [], []>} : vector<64x64xbf16>, vector<64x8xbf16>, vector<64x8xf32> -> vector<64x8xf32>
    %69 = vector.extract_strided_slice %40 {offsets = [0, 8], sizes = [64, 8], strides = [1, 1]} : vector<64x19xf32> to vector<64x8xf32>
    %70 = arith.addf %68, %69 : vector<64x8xf32>
    %c0_25 = arith.constant 0 : index
    %c0_26 = arith.constant 0 : index
    %71 = vector.load %arg3[%c0_25, %c0_26] : memref<64x8xf32, #tpu.memory_space<vmem>>, vector<64x8xf32>
    tpu.vector_store %arg3[%c0_25, %c0_26], %70 {strides = array<i32>} : memref<64x8xf32, #tpu.memory_space<vmem>>, vector<64x8xf32>,
    return
  }
}

</mosaic_0001>

<bundles_post_ra>
// kernel: tpu_custom_call.1
= control target key start
LH: loop header
LB: loop body
LE: loop exit
PB: predicated region body
PF: predicated region fallthrough
CT: control target
= control target key end

     0   :  { %8 = vsyncpa [#allocation3], 0  ;;  %s1598_s0 = inlined_call_operand.hbm [shape: f32[64,67], index: 0, kind: input, shape index: {}]   ;;  %s1599_s1 = inlined_call_operand.hbm [shape: f32[64,64], index: 1, kind: input, shape index: {}]   ;;  %s1600_s2 = inlined_call_operand.vmem [shape: bf16[33,19], index: 2, kind: input, shape index: {}]   ;;  %s1601_s3 = inlined_call_operand.vmem [shape: f32[64,8], index: 3, kind: output, shape index: {}]  }
   0x1   :  { %s14_s14 = sshll.u32 %s1598_s0, 4  ;;  %s15_s14 = int_to_ptr.hbm [resolvable:$true] %s14_s14 }
   0x2   :  { %9 = vsyncpa [#allocation5], 0  ;;  %s1195_s15 = smov [#allocation2]   ;;  %s27_s19 = sshll.u32 %s1599_s1, 4  ;;  %s28_s19 = int_to_ptr.hbm [resolvable:$true] %s27_s19 }
   0x3   :  { %s16_s16 = sshll.u32 %s1195_s15, 4  ;;  %s1196_s20 = smov 128   ;;  %s17_s16 = int_to_ptr.vmem [resolvable:$true] %s16_s16 }
   0x4   :  { %s1197_s21 = smov 8   ;;  %s1198_s22 = smov [#allocation4]  }
   0x5   :  { %22 = dma.hbm_to_vmem [thread:$0]  %s15_s14, 1024, %s17_s16, [#allocation3], %s1196_s20, %s1196_s20, %s1197_s21  }
   0x6   :  { %s29_s23 = sshll.u32 %s1198_s22, 4  ;;  %s30_s23 = int_to_ptr.vmem [resolvable:$true] %s29_s23 }
   0x7   :  { %35 = dma.hbm_to_vmem [thread:$0]  %s28_s19, 1024, %s30_s23, [#allocation5], %s1196_s20, %s1196_s20, %s1197_s21  }
   0x8   :  { %1191 = dma.done.wait [#allocation3], 1024  }
   0x9   :  { %1192 = vsyncadd [#allocation3], 4294966272 }
   0xa   :  { %1193 = dma.done.wait [#allocation5], 1024  }
   0xb   :  { %1194 = vsyncadd [#allocation5], 4294966272  ;;  %v1231_v0 = vld [vmem:[#allocation2 + $0x38] sm:$0xff]  ;;  %v1233_v1 = vld [vmem:[#allocation2 + $0x28] sm:$0xff]  ;;  %s1199_s0 = smov 63   ;;  %s1200_s1 = smov 64  }
   0xc   :  { %101 = vrot.lane.b32.xlu0 %v1231_v0, %s1199_s0  ;;  %97 = vrot.lane.b32.xlu1 %v1233_v1, %s1199_s0  ;;  %v1237_v2 = vld [vmem:[#allocation2 + $0x18] sm:$0xff]  ;;  %v1240_v3 = vld [vmem:[#allocation2 + $0x30] sm:$0xff]  ;;  %v1242_v4 = vld [vmem:[#allocation2 + $0x20] sm:$0xff]  ;;  %vm103_vm0 = vcmask 15360   ;;  %vm217_vm3 = vcmask 523264   ;;  %s1201_s24 = smov 96  }
   0xd   :  { %93 = vrot.lane.b32.xlu2 %v1237_v2, %s1199_s0  ;;  %v1244_v5 = vld [vmem:[#allocation2 + $0x10] sm:$0xff]  ;;  %v1249_v6 = vld [vmem:[#allocation2 + $0x8] sm:$0xff]  ;;  %v1251_v7 = vld [vmem:[#allocation2] sm:$0xff]  ;;  %s1202_s4 = smov 111   ;;  %s1204_s5 = smov 120  }
   0xe   :  { %v1279_v24 = vld [vmem:[#allocation4] sm:$0xff]  ;;  %v1288_v30 = vld [vmem:[#allocation4 + $0x8] sm:$0xff]  ;;  %v1297_v36 = vld [vmem:[#allocation4 + $0x10] sm:$0xff] }
   0xf   :  { %vm201_vm2 = vcmp.gt.f32.partialorder %v1279_v24, 0.0  ;;  %vm202_vm5 = vcmp.gt.f32.partialorder %v1288_v30, 0.0  ;;  %vm203_vm7 = vcmp.gt.f32.partialorder %v1297_v36, 0.0  ;;  %v1306_v42 = vld [vmem:[#allocation4 + $0x18] sm:$0xff]  ;;  %v1312_v48 = vld [vmem:[#allocation4 + $0x20] sm:$0xff]  ;;  %v1318_v54 = vld [vmem:[#allocation4 + $0x28] sm:$0xff] }
  0x10   :  { %vm204_vm9 = vcmp.gt.f32.partialorder %v1306_v42, 0.0  ;;  %vm205_vm11 = vcmp.gt.f32.partialorder %v1312_v48, 0.0  ;;  %vm206_vm13 = vcmp.gt.f32.partialorder %v1318_v54, 0.0  ;;  %v1324_v60 = vld [vmem:[#allocation4 + $0x30] sm:$0xff] }
  0x11   :  { %vm1603_vm15 = vcmp.gt.f32.partialorder %v1324_v60, 0.0 }
  0x14   :  { %99 = vrot.lane.b32.xlu0 %v1240_v3, %s1199_s0  ;;  %95 = vrot.lane.b32.xlu1 %v1242_v4, %s1199_s0 }
  0x15   :  { %91 = vrot.lane.b32.xlu2 %v1244_v5, %s1199_s0 }
  0x1c   :  { %89 = vrot.lane.b32.xlu0 %v1249_v6, %s1199_s0  ;;  %87 = vrot.lane.b32.xlu1 %v1251_v7, %s1199_s0 }
  0x1d   :  { %71 = vrot.lane.b32.xlu2 %v1251_v7, %s1200_s1 }
  0x24   :  { %73 = vrot.lane.b32.xlu0 %v1249_v6, %s1200_s1  ;;  %75 = vrot.lane.b32.xlu1 %v1244_v5, %s1200_s1 }
  0x25   :  { %77 = vrot.lane.b32.xlu2 %v1237_v2, %s1200_s1 }
  0x2c   :  { %79 = vrot.lane.b32.xlu0 %v1242_v4, %s1200_s1  ;;  %81 = vrot.lane.b32.xlu1 %v1233_v1, %s1200_s1 }
  0x2d   :  { %83 = vrot.lane.b32.xlu2 %v1240_v3, %s1200_s1 }
  0x34   :  { %85 = vrot.lane.b32.xlu0 %v1231_v0, %s1200_s1 }
  0x67   :  { %v94_v11 = vpop.permute.xlu2 %93 }
  0x6f   :  { %v92_v13 = vpop.permute.xlu2 %91 }
  0x77   :  { %v72_v16 = vpop.permute.xlu2 %71 }
  0x7e   :  { %v102_v8 = vpop.permute.xlu0 %101  ;;  %v98_v9 = vpop.permute.xlu1 %97 }
  0x7f   :  { %1013 = vmatpush.xpose.msk.msra.mxu0 %vm103_vm0, %v102_v8  ;;  %v78_v19 = vpop.permute.xlu2 %77 }
  0x86   :  { %v100_v10 = vpop.permute.xlu0 %99  ;;  %v96_v12 = vpop.permute.xlu1 %95 }
  0x87   :  { %1014 = vmatpush.xpose.msk.msra.mxu0 %vm103_vm0, %v100_v10  ;;  %v84_v22 = vpop.permute.xlu2 %83  ;;  %v1330_v10 = vld [vmem:[#allocation4 + $0x38] sm:$0xff] }
  0x8b   :  { %1015 = vmatpush.xpose.msk.msra.mxu0 %vm103_vm0, %v98_v9 }
  0x8e   :  { %v90_v14 = vpop.permute.xlu0 %89  ;;  %v88_v15 = vpop.permute.xlu1 %87 }
  0x8f   :  { %1016 = vmatpush.xpose.msk.msra.mxu0 %vm103_vm0, %v96_v12 }
  0x93   :  { %1017 = vmatpush.xpose.msk.msra.mxu0 %vm103_vm0, %v94_v11 }
  0x96   :  { %v74_v17 = vpop.permute.xlu0 %73  ;;  %v76_v18 = vpop.permute.xlu1 %75 }
  0x97   :  { %1018 = vmatpush.xpose.msk.msra.mxu0 %vm103_vm0, %v92_v13 }
  0x9b   :  { %1019 = vmatpush.xpose.msk.msra.mxu0 %vm103_vm0, %v90_v14 }
  0x9e   :  { %v80_v20 = vpop.permute.xlu0 %79  ;;  %v82_v21 = vpop.permute.xlu1 %81 }
  0x9f   :  { %1020 = vmatpush.xpose.msk.msra.mxu0 %vm103_vm0, %v88_v15 }
  0xa2   :  { %1021 = vmatmul.msk.f32.vlgmr.msra.gmra.mxu0 %vm103_vm0, %v72_v16 }
  0xa6   :  { %v86_v23 = vpop.permute.xlu0 %85 }
  0xaa   :  { %1022 = vmatmul.msk.f32.gmra.mxu0 %vm103_vm0, %v74_v17 }
  0xb2   :  { %1023 = vmatmul.msk.f32.gmra.mxu0 %vm103_vm0, %v76_v18 }
  0xba   :  { %1024 = vmatmul.msk.f32.gmra.mxu0 %vm103_vm0, %v78_v19 }
  0xc2   :  { %1025 = vmatmul.msk.f32.gmra.mxu0 %vm103_vm0, %v80_v20 }
  0xca   :  { %1026 = vmatmul.msk.f32.gmra.mxu0 %vm103_vm0, %v82_v21 }
  0xd2   :  { %1027 = vmatmul.msk.f32.gmra.mxu0 %vm103_vm0, %v84_v22 }
  0xda   :  { %1028 = vmatmul.msk.f32.gmra.mxu0 %vm103_vm0, %v86_v23 }
 0x11f   :  { %v153_v25 = vpop.f32.mrf.mxu0 }
 0x120   :  { %vm177_vm1 = vcmp.ge.f32.partialorder %v153_v25, 0.0  ;;  %v185_v26 = vmul.f32 0.2, %v153_v25 }
 0x122   :  { %v193_v27 = vsel %vm177_vm1, %v153_v25, %v185_v26 }
 0x123   :  { %v1284_v28 = vsel %vm201_vm2, %v193_v27, -1e+30 }
 0x124   :  { %v218_v29 = vsel %vm217_vm3, %v1284_v28, -inf }
 0x125   :  { %219 = vmax.xlane.f32.xlu1 %v218_v29 }
 0x127   :  { %v156_v31 = vpop.f32.mrf.mxu0 }
 0x128   :  { %vm178_vm4 = vcmp.ge.f32.partialorder %v156_v31, 0.0  ;;  %v186_v32 = vmul.f32 0.2, %v156_v31 }
 0x12a   :  { %v194_v33 = vsel %vm178_vm4, %v156_v31, %v186_v32  ;;  %vm1602_vm4 = vcmp.gt.f32.partialorder %v1330_v10, 0.0 }
 0x12b   :  { %v1293_v34 = vsel %vm202_vm5, %v194_v33, -1e+30 }
 0x12c   :  { %v221_v35 = vsel %vm217_vm3, %v1293_v34, -inf }
 0x12d   :  { %222 = vmax.xlane.f32.xlu2 %v221_v35 }
 0x12f   :  { %v159_v37 = vpop.f32.mrf.mxu0 }
 0x130   :  { %vm179_vm6 = vcmp.ge.f32.partialorder %v159_v37, 0.0  ;;  %v187_v38 = vmul.f32 0.2, %v159_v37 }
 0x132   :  { %v195_v39 = vsel %vm179_vm6, %v159_v37, %v187_v38 }
 0x133   :  { %v1302_v40 = vsel %vm203_vm7, %v195_v39, -1e+30 }
 0x134   :  { %v224_v41 = vsel %vm217_vm3, %v1302_v40, -inf }
 0x135   :  { %225 = vmax.xlane.f32.xlu0 %v224_v41 }
 0x137   :  { %v162_v43 = vpop.f32.mrf.mxu0 }
 0x138   :  { %vm180_vm8 = vcmp.ge.f32.partialorder %v162_v43, 0.0  ;;  %v188_v44 = vmul.f32 0.2, %v162_v43 }
 0x13a   :  { %v196_v45 = vsel %vm180_vm8, %v162_v43, %v188_v44 }
 0x13b   :  { %v212_v46 = vsel %vm204_vm9, %v196_v45, -1e+30 }
 0x13c   :  { %v227_v47 = vsel %vm217_vm3, %v212_v46, -inf }
 0x13d   :  { %228 = vmax.xlane.f32.xlu2 %v227_v47 }
 0x13f   :  { %v165_v49 = vpop.f32.mrf.mxu0 }
 0x140   :  { %vm181_vm10 = vcmp.ge.f32.partialorder %v165_v49, 0.0  ;;  %v189_v50 = vmul.f32 0.2, %v165_v49 }
 0x142   :  { %v197_v51 = vsel %vm181_vm10, %v165_v49, %v189_v50 }
 0x143   :  { %v213_v52 = vsel %vm205_vm11, %v197_v51, -1e+30 }
 0x144   :  { %v230_v53 = vsel %vm217_vm3, %v213_v52, -inf }
 0x145   :  { %231 = vmax.xlane.f32.xlu1 %v230_v53 }
 0x147   :  { %v168_v55 = vpop.f32.mrf.mxu0 }
 0x148   :  { %vm182_vm12 = vcmp.ge.f32.partialorder %v168_v55, 0.0  ;;  %v190_v56 = vmul.f32 0.2, %v168_v55 }
 0x14a   :  { %v198_v57 = vsel %vm182_vm12, %v168_v55, %v190_v56 }
 0x14b   :  { %v214_v58 = vsel %vm206_vm13, %v198_v57, -1e+30 }
 0x14c   :  { %v233_v59 = vsel %vm217_vm3, %v214_v58, -inf }
 0x14d   :  { %234 = vmax.xlane.f32.xlu2 %v233_v59 }
 0x14f   :  { %v171_v61 = vpop.f32.mrf.mxu0 }
 0x150   :  { %vm183_vm14 = vcmp.ge.f32.partialorder %v171_v61, 0.0  ;;  %v191_v62 = vmul.f32 0.2, %v171_v61 }
 0x152   :  { %v199_v63 = vsel %vm183_vm14, %v171_v61, %v191_v62 }
 0x153   :  { %v215_v8 = vsel %vm1603_vm15, %v199_v63, -1e+30 }
 0x154   :  { %v236_v9 = vsel %vm217_vm3, %v215_v8, -inf }
 0x155   :  { %237 = vmax.xlane.f32.xlu0 %v236_v9 }
 0x157   :  { %v174_v11 = vpop.f32.mrf.mxu0 }
 0x158   :  { %vm184_vm1 = vcmp.ge.f32.partialorder %v174_v11, 0.0  ;;  %v192_v12 = vmul.f32 0.2, %v174_v11 }
 0x15a   :  { %v200_v13 = vsel %vm184_vm1, %v174_v11, %v192_v12 }
 0x15b   :  { %v216_v14 = vsel %vm1602_vm4, %v200_v13, -1e+30 }
 0x15c   :  { %v239_v15 = vsel %vm217_vm3, %v216_v14, -inf }
 0x15d   :  { %240 = vmax.xlane.f32.xlu1 %v239_v15 }
 0x198   :  { %v220_v16 = vpop.xlane.xlu1 %219 }
 0x199   :  { %v242_v17 = vsub.f32 %v1284_v28, %v220_v16 }
 0x19b   :  { %v250_v18 = vmul.f32 1.442695, %v242_v17  ;;  %v432_v17 = vpack.c.bf16 %v1233_v1, %v1242_v4 }
 0x19d   :  { %1079 = vpow2.f32 %v250_v18  ;;  %v431_v18 = vpack.c.bf16 %v1237_v2, %v1244_v5 }
 0x1a0   :  { %v223_v19 = vpop.xlane.xlu2 %222 }
 0x1a1   :  { %v243_v20 = vsub.f32 %v1293_v34, %v223_v19  ;;  %v430_v19 = vpack.c.bf16 %v1249_v6, %v1251_v7 }
 0x1a3   :  { %v1080_v21 = vpop.eup %1079  ;;  %v252_v22 = vmul.f32 1.442695, %v243_v20 }
 0x1a4   :  { %v1339_v23 = vmul.f32 %v1080_v21, %v1279_v24 }
 0x1a5   :  { %1081 = vpow2.f32 %v252_v22 }
 0x1a6   :  { %v274_v25 = vsel %vm217_vm3, %v1339_v23, 0.0 }
 0x1a7   :  { %275 = vadd.xlane.f32.xlu2 %v274_v25 }
 0x1a8   :  { %v226_v26 = vpop.xlane.xlu0 %225 }
 0x1a9   :  { %v244_v27 = vsub.f32 %v1302_v40, %v226_v26 }
 0x1ab   :  { %v1082_v29 = vpop.eup %1081  ;;  %v254_v28 = vmul.f32 1.442695, %v244_v27 }
 0x1ac   :  { %v1345_v31 = vmul.f32 %v1082_v29, %v1288_v30 }
 0x1ad   :  { %1083 = vpow2.f32 %v254_v28 }
 0x1ae   :  { %v277_v32 = vsel %vm217_vm3, %v1345_v31, 0.0 }
 0x1af   :  { %278 = vadd.xlane.f32.xlu0 %v277_v32 }
 0x1b0   :  { %v229_v33 = vpop.xlane.xlu2 %228 }
 0x1b1   :  { %v245_v34 = vsub.f32 %v212_v46, %v229_v33 }
 0x1b3   :  { %v1084_v35 = vpop.eup %1083  ;;  %v256_v37 = vmul.f32 1.442695, %v245_v34 }
 0x1b4   :  { %v1350_v38 = vmul.f32 %v1084_v35, %v1297_v36 }
 0x1b5   :  { %1085 = vpow2.f32 %v256_v37 }
 0x1b6   :  { %v280_v39 = vsel %vm217_vm3, %v1350_v38, 0.0 }
 0x1b7   :  { %281 = vadd.xlane.f32.xlu1 %v280_v39 }
 0x1b8   :  { %v232_v40 = vpop.xlane.xlu1 %231 }
 0x1b9   :  { %v246_v41 = vsub.f32 %v213_v52, %v232_v40 }
 0x1bb   :  { %v1086_v43 = vpop.eup %1085  ;;  %v258_v44 = vmul.f32 1.442695, %v246_v41 }
 0x1bc   :  { %v1355_v45 = vmul.f32 %v1086_v43, %v1306_v42 }
 0x1bd   :  { %1087 = vpow2.f32 %v258_v44 }
 0x1be   :  { %v283_v46 = vsel %vm217_vm3, %v1355_v45, 0.0 }
 0x1bf   :  { %284 = vadd.xlane.f32.xlu2 %v283_v46 }
 0x1c0   :  { %v235_v47 = vpop.xlane.xlu2 %234 }
 0x1c1   :  { %v247_v49 = vsub.f32 %v214_v58, %v235_v47 }
 0x1c3   :  { %v1088_v50 = vpop.eup %1087  ;;  %v260_v51 = vmul.f32 1.442695, %v247_v49 }
 0x1c4   :  { %v1360_v53 = vmul.f32 %v1088_v50, %v1312_v48 }
 0x1c5   :  { %1089 = vpow2.f32 %v260_v51 }
 0x1c6   :  { %v286_v52 = vsel %vm217_vm3, %v1360_v53, 0.0 }
 0x1c7   :  { %287 = vadd.xlane.f32.xlu0 %v286_v52 }
 0x1c8   :  { %v238_v55 = vpop.xlane.xlu0 %237 }
 0x1c9   :  { %v248_v56 = vsub.f32 %v215_v8, %v238_v55 }
 0x1cb   :  { %v1090_v57 = vpop.eup %1089  ;;  %v262_v59 = vmul.f32 1.442695, %v248_v56 }
 0x1cc   :  { %v1365_v61 = vmul.f32 %v1090_v57, %v1318_v54 }
 0x1cd   :  { %1091 = vpow2.f32 %v262_v59 }
 0x1ce   :  { %v289_v58 = vsel %vm217_vm3, %v1365_v61, 0.0 }
 0x1cf   :  { %290 = vadd.xlane.f32.xlu1 %v289_v58 }
 0x1d0   :  { %v241_v62 = vpop.xlane.xlu1 %240 }
 0x1d1   :  { %v249_v63 = vsub.f32 %v216_v14, %v241_v62  ;;  %v433_v14 = vpack.c.bf16 %v1231_v0, %v1240_v3 }
 0x1d3   :  { %v1092_v9 = vpop.eup %1091  ;;  %v264_v11 = vmul.f32 1.442695, %v249_v63  ;;  %474 = vmatpush.bf16.msra.mxu1 %v433_v14 }
 0x1d4   :  { %v1370_v12 = vmul.f32 %v1092_v9, %v1324_v60 }
 0x1d5   :  { %1093 = vpow2.f32 %v264_v11 }
 0x1d6   :  { %v292_v8 = vsel %vm217_vm3, %v1370_v12, 0.0 }
 0x1d7   :  { %293 = vadd.xlane.f32.xlu2 %v292_v8  ;;  %475 = vmatpush.bf16.msra.mxu1 %v432_v17 }
 0x1db   :  { %v1094_v13 = vpop.eup %1093  ;;  %476 = vmatpush.bf16.msra.mxu1 %v431_v18 }
 0x1dc   :  { %v1375_v15 = vmul.f32 %v1094_v13, %v1330_v10 }
 0x1de   :  { %v295_v16 = vsel %vm217_vm3, %v1375_v15, 0.0 }
 0x1df   :  { %296 = vadd.xlane.f32.xlu0 %v295_v16  ;;  %477 = vmatpush.bf16.msra.mxu1 %v430_v19 }
 0x1e8   :  { %442 = vrot.lane.b32.xlu1 %v1242_v4, %s1201_s24 }
 0x1ef   :  { %444 = vrot.lane.b32.xlu2 %v1233_v1, %s1201_s24 }
 0x1f0   :  { %448 = vrot.lane.b32.xlu1 %v1231_v0, %s1201_s24 }
 0x1f3   :  { %446 = vrot.lane.b32.xlu0 %v1240_v3, %s1201_s24 }
 0x1f7   :  { %436 = vrot.lane.b32.xlu2 %v1249_v6, %s1201_s24 }
 0x1f8   :  { %438 = vrot.lane.b32.xlu1 %v1244_v5, %s1201_s24 }
 0x1fb   :  { %434 = vrot.lane.b32.xlu0 %v1251_v7, %s1201_s24 }
 0x203   :  { %440 = vrot.lane.b32.xlu0 %v1237_v2, %s1201_s24 }
 0x21a   :  { %v276_v20 = vpop.xlane.xlu2 %275 }
 0x21b   :  { %v298_v21 = vmax.f32 %v276_v20, 1e-20 }
 0x21d   :  { %1095 = vrcp.f32 %v298_v21  ;;  %v317_v5 = vand.u32 2147483648, %v298_v21  ;;  %vm311_vm8 = vweird.f32 %v298_v21  ;;  %v315_v7 = vand.u32 2147483647, %v298_v21 }
 0x21f   :  { %v318_v37 = vor.u32 1.1754944e-38, %v317_v5  ;;  %vm316_vm14 = vcmp.eq.f32.partialorder %v315_v7, 8.507059e+37  ;;  %v1066_v5 = vld [vmem:[%s1600_s2 + $0x8] sm:$0xff] }
 0x220   :  { %549 = vmatpush.bf16.msrb.mxu1 %v1066_v5  ;;  %1067 = vmatpush.bf16.msra.mxu2 %v1066_v5 }
 0x222   :  { %v279_v22 = vpop.xlane.xlu0 %278 }
 0x223   :  { %v1096_v25 = vpop.eup %1095  ;;  %v299_v26 = vmax.f32 %v279_v22, 1e-20 }
 0x224   :  { %v307_v0 = vmul.f32 %v1096_v25, %v298_v21  ;;  %vm312_vm6 = vweird.f32 %v1096_v25 }
 0x225   :  { %1097 = vrcp.f32 %v299_v26  ;;  %vm313_vm10 = vmor %vm311_vm8, %vm312_vm6  ;;  %v332_v32 = vand.u32 2147483648, %v299_v26  ;;  %v330_v35 = vand.u32 2147483647, %v299_v26  ;;  %vm326_vm1 = vweird.f32 %v299_v26 }
 0x226   :  { %v308_v3 = vsub.f32 1.0, %v307_v0 }
 0x227   :  { %v333_v46 = vor.u32 1.1754944e-38, %v332_v32  ;;  %vm331_vm15 = vcmp.eq.f32.partialorder %v330_v35, 8.507059e+37 }
 0x228   :  { %v309_v27 = vmul.f32 %v1096_v25, %v308_v3 }
 0x22a   :  { %v282_v1 = vpop.xlane.xlu1 %281  ;;  %v310_v2 = vadd.f32 %v1096_v25, %v309_v27 }
 0x22b   :  { %v1098_v4 = vpop.eup %1097  ;;  %v300_v29 = vmax.f32 %v282_v1, 1e-20 }
 0x22c   :  { %v322_v28 = vmul.f32 %v1098_v4, %v299_v26  ;;  %v314_v34 = vsel %vm313_vm10, %v1096_v25, %v310_v2  ;;  %vm327_vm12 = vweird.f32 %v1098_v4 }
 0x22d   :  { %1099 = vrcp.f32 %v300_v29  ;;  %v319_v44 = vsel %vm316_vm14, %v318_v37, %v314_v34  ;;  %vm328_vm4 = vmor %vm326_vm1, %vm327_vm12  ;;  %v347_v11 = vand.u32 2147483648, %v300_v29  ;;  %v345_v13 = vand.u32 2147483647, %v300_v29 }
 0x22e   :  { %v323_v6 = vsub.f32 1.0, %v322_v28  ;;  %v320_v52 = vmul.f32 %v319_v44, %v1339_v23 }
 0x22f   :  { %v348_v17 = vor.u32 1.1754944e-38, %v347_v11  ;;  %vm346_vm10 = vcmp.eq.f32.partialorder %v345_v13, 8.507059e+37 }
 0x230   :  { %v324_v33 = vmul.f32 %v1098_v4, %v323_v6 }
 0x232   :  { %v285_v39 = vpop.xlane.xlu2 %284  ;;  %v325_v40 = vadd.f32 %v1098_v4, %v324_v33 }
 0x233   :  { %v1100_v41 = vpop.eup %1099  ;;  %v301_v43 = vmax.f32 %v285_v39, 1e-20 }
 0x234   :  { %v337_v47 = vmul.f32 %v1100_v41, %v300_v29  ;;  %v329_v49 = vsel %vm328_vm4, %v1098_v4, %v325_v40  ;;  %vm342_vm6 = vweird.f32 %v1100_v41  ;;  %vm341_vm4 = vweird.f32 %v300_v29 }
 0x235   :  { %1101 = vrcp.f32 %v301_v43  ;;  %v334_v50 = vsel %vm331_vm15, %v333_v46, %v329_v49  ;;  %vm343_vm15 = vmor %vm341_vm4, %vm342_vm6  ;;  %v362_v16 = vand.u32 2147483648, %v301_v43  ;;  %vm356_vm12 = vweird.f32 %v301_v43 }
 0x236   :  { %v338_v51 = vsub.f32 1.0, %v337_v47  ;;  %v335_v55 = vmul.f32 %v334_v50, %v1345_v31  ;;  %v360_v31 = vand.u32 2147483647, %v301_v43 }
 0x237   :  { %v363_v25 = vor.u32 1.1754944e-38, %v362_v16 }
 0x238   :  { %v339_v56 = vmul.f32 %v1100_v41, %v338_v51  ;;  %v426_v57 = vpack.c.bf16 %v335_v55, %v320_v52  ;;  %vm361_vm1 = vcmp.eq.f32.partialorder %v360_v31, 8.507059e+37 }
 0x23a   :  { %1029 = vmatmul.msk.bf16.vlgmr.msra.gmra.mxu1 %vm217_vm3, %v426_v57  ;;  %v288_v59 = vpop.xlane.xlu0 %287  ;;  %v340_v9 = vadd.f32 %v1100_v41, %v339_v56 }
 0x23b   :  { %v1102_v58 = vpop.eup %1101  ;;  %v302_v62 = vmax.f32 %v288_v59, 1e-20 }
 0x23c   :  { %v352_v63 = vmul.f32 %v1102_v58, %v301_v43  ;;  %v344_v14 = vsel %vm343_vm15, %v1100_v41, %v340_v9  ;;  %vm357_vm8 = vweird.f32 %v1102_v58 }
 0x23d   :  { %1103 = vrcp.f32 %v302_v62  ;;  %v349_v22 = vsel %vm346_vm10, %v348_v17, %v344_v14  ;;  %vm358_vm14 = vmor %vm356_vm12, %vm357_vm8  ;;  %vm371_vm4 = vweird.f32 %v302_v62 }
 0x23e   :  { %v353_v8 = vsub.f32 1.0, %v352_v63  ;;  %v350_v1 = vmul.f32 %v349_v22, %v1350_v38  ;;  %v377_v38 = vand.u32 2147483648, %v302_v62 }
 0x240   :  { %v354_v23 = vmul.f32 %v1102_v58, %v353_v8  ;;  %v378_v41 = vor.u32 1.1754944e-38, %v377_v38 }
 0x242   :  { %v291_v18 = vpop.xlane.xlu1 %290  ;;  %v355_v19 = vadd.f32 %v1102_v58, %v354_v23 }
 0x243   :  { %v1104_v20 = vpop.eup %1103  ;;  %v303_v21 = vmax.f32 %v291_v18, 1e-20 }
 0x244   :  { %v367_v26 = vmul.f32 %v1104_v20, %v302_v62  ;;  %v359_v0 = vsel %vm358_vm14, %v1102_v58, %v355_v19  ;;  %vm372_vm6 = vweird.f32 %v1104_v20 }
 0x245   :  { %1105 = vrcp.f32 %v303_v21  ;;  %v364_v3 = vsel %vm361_vm1, %v363_v25, %v359_v0  ;;  %vm373_vm15 = vmor %vm371_vm4, %vm372_vm6  ;;  %v392_v35 = vand.u32 2147483648, %v303_v21  ;;  %v390_v40 = vand.u32 2147483647, %v303_v21  ;;  %v1065_v0 = vld [vmem:[%s1600_s2] sm:$0xff] }
 0x246   :  { %v368_v27 = vsub.f32 1.0, %v367_v26  ;;  %v365_v4 = vmul.f32 %v364_v3, %v1355_v45  ;;  %v375_v45 = vand.u32 2147483647, %v302_v62  ;;  %vm386_vm12 = vweird.f32 %v303_v21  ;;  %550 = vmatpush.bf16.msrb.mxu1 %v1065_v0  ;;  %1068 = vmatpush.bf16.msra.mxu2 %v1065_v0 }
 0x247   :  { %v393_v50 = vor.u32 1.1754944e-38, %v392_v35  ;;  %vm391_vm1 = vcmp.eq.f32.partialorder %v390_v40, 8.507059e+37 }
 0x248   :  { %v369_v29 = vmul.f32 %v1104_v20, %v368_v27  ;;  %v427_v28 = vpack.c.bf16 %v365_v4, %v350_v1  ;;  %vm376_vm10 = vcmp.eq.f32.partialorder %v375_v45, 8.507059e+37 }
 0x24a   :  { %v294_v2 = vpop.xlane.xlu2 %293  ;;  %1030 = vmatmul.msk.bf16.gmra.mxu1 %vm217_vm3, %v427_v28  ;;  %v370_v33 = vadd.f32 %v1104_v20, %v369_v29 }
 0x24b   :  { %v1106_v6 = vpop.eup %1105  ;;  %v304_v7 = vmax.f32 %v294_v2, 1e-20 }
 0x24c   :  { %v382_v32 = vmul.f32 %v1106_v6, %v303_v21  ;;  %v374_v39 = vsel %vm373_vm15, %v1104_v20, %v370_v33  ;;  %vm387_vm8 = vweird.f32 %v1106_v6 }
 0x24d   :  { %1107 = vrcp.f32 %v304_v7  ;;  %v379_v49 = vsel %vm376_vm10, %v378_v41, %v374_v39  ;;  %vm388_vm14 = vmor %vm386_vm12, %vm387_vm8  ;;  %v407_v8 = vand.u32 2147483648, %v304_v7  ;;  %vm401_vm4 = vweird.f32 %v304_v7 }
 0x24e   :  { %v383_v34 = vsub.f32 1.0, %v382_v32  ;;  %v380_v57 = vmul.f32 %v379_v49, %v1360_v53  ;;  %v405_v16 = vand.u32 2147483647, %v304_v7 }
 0x24f   :  { %v408_v17 = vor.u32 1.1754944e-38, %v407_v8 }
 0x250   :  { %v384_v37 = vmul.f32 %v1106_v6, %v383_v34  ;;  %vm406_vm10 = vcmp.eq.f32.partialorder %v405_v16, 8.507059e+37 }
 0x252   :  { %v297_v43 = vpop.xlane.xlu0 %296  ;;  %v385_v44 = vadd.f32 %v1106_v6, %v384_v37  ;;  %v445_v27 = vpop.permute.xlu2 %444 }
 0x253   :  { %v1108_v46 = vpop.eup %1107  ;;  %v305_v47 = vmax.f32 %v297_v43, 1e-20 }
 0x254   :  { %v397_v51 = vmul.f32 %v1108_v46, %v304_v7  ;;  %v389_v52 = vsel %vm388_vm14, %v1106_v6, %v385_v44  ;;  %vm402_vm6 = vweird.f32 %v1108_v46 }
 0x255   :  { %1109 = vrcp.f32 %v305_v47  ;;  %v394_v55 = vsel %vm391_vm1, %v393_v50, %v389_v52  ;;  %vm403_vm15 = vmor %vm401_vm4, %vm402_vm6  ;;  %v422_v23 = vand.u32 2147483648, %v305_v47  ;;  %v420_v53 = vand.u32 2147483647, %v305_v47 }
 0x256   :  { %v398_v56 = vsub.f32 1.0, %v397_v51  ;;  %v395_v59 = vmul.f32 %v394_v55, %v1365_v61  ;;  %vm416_vm12 = vweird.f32 %v305_v47  ;;  %vm530_vm6 = vcmask 261120  }
 0x257   :  { %v423_v19 = vor.u32 1.1754944e-38, %v422_v23  ;;  %vm421_vm1 = vcmp.eq.f32.partialorder %v420_v53, 8.507059e+37 }
 0x258   :  { %v399_v58 = vmul.f32 %v1108_v46, %v398_v56  ;;  %v428_v62 = vpack.c.bf16 %v395_v59, %v380_v57 }
 0x25a   :  { %1031 = vmatmul.msk.bf16.gmra.mxu1 %vm217_vm3, %v428_v62  ;;  %v400_v11 = vadd.f32 %v1108_v46, %v399_v58  ;;  %v443_v4 = vpop.permute.xlu1 %442  ;;  %v437_v28 = vpop.permute.xlu2 %436 }
 0x25b   :  { %v1110_v63 = vpop.eup %1109 }
 0x25c   :  { %v412_v9 = vmul.f32 %v1110_v63, %v305_v47  ;;  %v404_v31 = vsel %vm403_vm15, %v1108_v46, %v400_v11  ;;  %vm417_vm8 = vweird.f32 %v1110_v63 }
 0x25d   :  { %v409_v18 = vsel %vm406_vm10, %v408_v17, %v404_v31  ;;  %vm418_vm14 = vmor %vm416_vm12, %vm417_vm8  ;;  %vm1604_vm8 = vcmp.gt.f32.partialorder %v1324_v60, 0.0  ;;  %vm1605_vm10 = vcmp.gt.f32.partialorder %v1330_v10, 0.0 }
 0x25e   :  { %v413_v13 = vsub.f32 1.0, %v412_v9  ;;  %v410_v22 = vmul.f32 %v409_v18, %v1370_v12  ;;  %v515_v9 = vld [vmem:[%s1600_s2 + $0x10] sm:$0x1]  ;;  %s1203_s2 = smov 112  }
 0x260   :  { %v414_v14 = vmul.f32 %v1110_v63, %v413_v13  ;;  %v516_v13 = vunpack.c.l.bf16 %v515_v9 }
 0x262   :  { %v415_v61 = vadd.f32 %v1110_v63, %v414_v14  ;;  %v449_v6 = vpop.permute.xlu1 %448  ;;  %v517_v16 = vperm.slane %v516_v13, 0 }
 0x264   :  { %v419_v20 = vsel %vm418_vm14, %v1110_v63, %v415_v61 }
 0x265   :  { %v424_v21 = vsel %vm421_vm1, %v423_v19, %v419_v20  ;;  %v447_v3 = vpop.permute.xlu0 %446 }
 0x266   :  { %v425_v25 = vmul.f32 %v424_v21, %v1375_v15 }
 0x268   :  { %v429_v26 = vpack.c.bf16 %v425_v25, %v410_v22 }
 0x26a   :  { %1032 = vmatmul.msk.bf16.gmra.mxu1 %vm217_vm3, %v429_v26  ;;  %v439_v38 = vpop.permute.xlu1 %438 }
 0x26d   :  { %v435_v29 = vpop.permute.xlu0 %434 }
 0x275   :  { %v441_v34 = vpop.permute.xlu0 %440 }
 0x2b7   :  { %v479_v1 = vpop.f32.mrf.mxu1 }
 0x2b8   :  { %v480_v2 = vadd.f32 %v479_v1, %v435_v29 }
 0x2ba   :  { %v499_v15 = vmax.f32 %v480_v2, 0.0 }
 0x2bf   :  { %v481_v5 = vpop.f32.mrf.mxu1 }
 0x2c0   :  { %v482_v12 = vadd.f32 %v481_v5, %v437_v28 }
 0x2c2   :  { %v500_v7 = vmax.f32 %v482_v12, 0.0 }
 0x2c4   :  { %v507_v32 = vpack.c.bf16 %v500_v7, %v499_v15 }
 0x2c6   :  { %1041 = vmatmul.msk.bf16.vlgmr.msrb.gmra.mxu1 %vm530_vm6, %v507_v32 }
 0x2c7   :  { %v484_v33 = vpop.f32.mrf.mxu1 }
 0x2c8   :  { %v485_v45 = vadd.f32 %v484_v33, %v439_v38 }
 0x2ca   :  { %v501_v39 = vmax.f32 %v485_v45, 0.0 }
 0x2cf   :  { %v486_v35 = vpop.f32.mrf.mxu1 }
 0x2d0   :  { %v487_v37 = vadd.f32 %v486_v35, %v441_v34 }
 0x2d2   :  { %v502_v40 = vmax.f32 %v487_v37, 0.0 }
 0x2d4   :  { %v508_v41 = vpack.c.bf16 %v502_v40, %v501_v39 }
 0x2d6   :  { %1042 = vmatmul.msk.bf16.gmra.mxu1 %vm530_vm6, %v508_v41 }
 0x2d7   :  { %v489_v43 = vpop.f32.mrf.mxu1 }
 0x2d8   :  { %v490_v44 = vadd.f32 %v489_v43, %v443_v4 }
 0x2da   :  { %v503_v49 = vmax.f32 %v490_v44, 0.0 }
 0x2df   :  { %v491_v46 = vpop.f32.mrf.mxu1 }
 0x2e0   :  { %v492_v47 = vadd.f32 %v491_v46, %v445_v27 }
 0x2e2   :  { %v504_v50 = vmax.f32 %v492_v47, 0.0 }
 0x2e4   :  { %v509_v51 = vpack.c.bf16 %v504_v50, %v503_v49 }
 0x2e6   :  { %1043 = vmatmul.msk.bf16.vlgmr.msra.gmra.mxu2 %vm530_vm6, %v509_v51 }
 0x2e7   :  { %v494_v52 = vpop.f32.mrf.mxu1 }
 0x2e8   :  { %v495_v55 = vadd.f32 %v494_v52, %v447_v3 }
 0x2ea   :  { %v505_v59 = vmax.f32 %v495_v55, 0.0 }
 0x2ef   :  { %v496_v56 = vpop.f32.mrf.mxu1 }
 0x2f0   :  { %v497_v57 = vadd.f32 %v496_v56, %v449_v6 }
 0x2f2   :  { %v506_v58 = vmax.f32 %v497_v57, 0.0 }
 0x2f4   :  { %v510_v62 = vpack.c.bf16 %v506_v58, %v505_v59 }
 0x2f6   :  { %1044 = vmatmul.msk.bf16.gmra.mxu2 %vm530_vm6, %v510_v62 }
 0x343   :  { %v552_v63 = vpop.f32.mrf.mxu1 }
 0x344   :  { %v1433_v22 = vadd.f32 %v552_v63, %v517_v16 }
 0x34b   :  { %v554_v8 = vpop.f32.mrf.mxu1 }
 0x34c   :  { %v1444_v3 = vadd.f32 %v554_v8, %v517_v16 }
 0x34e   :  { %v929_v1 = vpack.c.bf16 %v1444_v3, %v1433_v22 }
 0x353   :  { %v557_v31 = vpop.f32.mrf.mxu1 }
 0x354   :  { %v1423_v17 = vadd.f32 %v557_v31, %v517_v16 }
 0x35b   :  { %v559_v18 = vpop.f32.mrf.mxu1 }
 0x35c   :  { %v1429_v20 = vadd.f32 %v559_v18, %v517_v16 }
 0x35e   :  { %v930_v27 = vpack.c.bf16 %v1429_v20, %v1423_v17 }
 0x369   :  { %v562_v11 = vpop.f32.mrf.mxu2 }
 0x36a   :  { %v1440_v26 = vadd.f32 %v562_v11, %v517_v16 }
 0x371   :  { %v564_v23 = vpop.f32.mrf.mxu2 }
 0x372   :  { %v1420_v14 = vadd.f32 %v564_v23, %v517_v16 }
 0x374   :  { %606 = vrot.lane.b32.xlu0 %v1420_v14, %s1202_s4  ;;  %v931_v0 = vpack.c.bf16 %v1420_v14, %v1440_v26 }
 0x379   :  { %v567_v53 = vpop.f32.mrf.mxu2 }
 0x37a   :  { %v1425_v61 = vadd.f32 %v567_v53, %v517_v16 }
 0x37c   :  { %608 = vrot.lane.b32.xlu1 %v1425_v61, %s1202_s4  ;;  %600 = vrot.lane.b32.xlu0 %v1423_v17, %s1202_s4 }
 0x381   :  { %v569_v19 = vpop.f32.mrf.mxu2 }
 0x382   :  { %v1431_v21 = vadd.f32 %v569_v19, %v517_v16 }
 0x384   :  { %610 = vrot.lane.b32.xlu2 %v1431_v21, %s1202_s4  ;;  %602 = vrot.lane.b32.xlu1 %v1429_v20, %s1202_s4  ;;  %v932_v25 = vpack.c.bf16 %v1431_v21, %v1425_v61 }
 0x385   :  { %580 = vrot.lane.b32.xlu0 %v1433_v22, %s1203_s2 }
 0x386   :  { %973 = vmatpush.bf16.msrb.mxu2 %v932_v25 }
 0x38a   :  { %974 = vmatpush.bf16.msrb.mxu2 %v931_v0 }
 0x38c   :  { %604 = vrot.lane.b32.xlu2 %v1440_v26, %s1202_s4  ;;  %596 = vrot.lane.b32.xlu1 %v1433_v22, %s1202_s4 }
 0x38d   :  { %586 = vrot.lane.b32.xlu0 %v1429_v20, %s1203_s2 }
 0x38e   :  { %975 = vmatpush.bf16.msrb.mxu2 %v930_v27 }
 0x392   :  { %976 = vmatpush.bf16.msrb.mxu2 %v929_v1 }
 0x394   :  { %598 = vrot.lane.b32.xlu2 %v1444_v3, %s1202_s4  ;;  %584 = vrot.lane.b32.xlu1 %v1423_v17, %s1203_s2 }
 0x395   :  { %592 = vrot.lane.b32.xlu0 %v1425_v61, %s1203_s2 }
 0x39c   :  { %582 = vrot.lane.b32.xlu2 %v1444_v3, %s1203_s2  ;;  %590 = vrot.lane.b32.xlu1 %v1420_v14, %s1203_s2 }
 0x3a4   :  { %588 = vrot.lane.b32.xlu2 %v1440_v26, %s1203_s2 }
 0x3ac   :  { %594 = vrot.lane.b32.xlu2 %v1431_v21, %s1203_s2 }
 0x3de   :  { %v611_v4 = vpop.permute.xlu2 %610 }
 0x3df   :  { %1045 = vmatpush.xpose.msk.msra.mxu3 %vm103_vm0, %v611_v4 }
 0x3e6   :  { %v607_v28 = vpop.permute.xlu0 %606  ;;  %v605_v2 = vpop.permute.xlu2 %604 }
 0x3ee   :  { %v609_v29 = vpop.permute.xlu1 %608  ;;  %v601_v12 = vpop.permute.xlu0 %600 }
 0x3ef   :  { %1046 = vmatpush.xpose.msk.msra.mxu3 %vm103_vm0, %v609_v29  ;;  %v599_v6 = vpop.permute.xlu2 %598 }
 0x3f3   :  { %1047 = vmatpush.xpose.msk.msra.mxu3 %vm103_vm0, %v607_v28 }
 0x3f6   :  { %v603_v5 = vpop.permute.xlu1 %602 }
 0x3f7   :  { %1048 = vmatpush.xpose.msk.msra.mxu3 %vm103_vm0, %v605_v2  ;;  %v581_v7 = vpop.permute.xlu0 %580  ;;  %v583_v32 = vpop.permute.xlu2 %582 }
 0x3fb   :  { %1049 = vmatpush.xpose.msk.msra.mxu3 %vm103_vm0, %v603_v5 }
 0x3fe   :  { %v597_v15 = vpop.permute.xlu1 %596 }
 0x3ff   :  { %1050 = vmatpush.xpose.msk.msra.mxu3 %vm103_vm0, %v601_v12  ;;  %v587_v38 = vpop.permute.xlu0 %586  ;;  %v589_v34 = vpop.permute.xlu2 %588 }
 0x403   :  { %1051 = vmatpush.xpose.msk.msra.mxu3 %vm103_vm0, %v599_v6 }
 0x406   :  { %v585_v33 = vpop.permute.xlu1 %584 }
 0x407   :  { %1052 = vmatpush.xpose.msk.msra.mxu3 %vm103_vm0, %v597_v15  ;;  %v593_v35 = vpop.permute.xlu0 %592  ;;  %v595_v37 = vpop.permute.xlu2 %594 }
 0x40a   :  { %1053 = vmatmul.msk.f32.vlgmr.msra.gmra.mxu3 %vm103_vm0, %v581_v7 }
 0x40e   :  { %v591_v45 = vpop.permute.xlu1 %590 }
 0x412   :  { %1054 = vmatmul.msk.f32.gmra.mxu3 %vm103_vm0, %v583_v32 }
 0x41a   :  { %1055 = vmatmul.msk.f32.gmra.mxu3 %vm103_vm0, %v585_v33 }
 0x422   :  { %1056 = vmatmul.msk.f32.gmra.mxu3 %vm103_vm0, %v587_v38 }
 0x42a   :  { %1057 = vmatmul.msk.f32.gmra.mxu3 %vm103_vm0, %v589_v34 }
 0x432   :  { %1058 = vmatmul.msk.f32.gmra.mxu3 %vm103_vm0, %v591_v45 }
 0x43a   :  { %1059 = vmatmul.msk.f32.gmra.mxu3 %vm103_vm0, %v593_v35 }
 0x442   :  { %1060 = vmatmul.msk.f32.gmra.mxu3 %vm103_vm0, %v595_v37 }
 0x48d   :  { %v661_v39 = vpop.f32.mrf.mxu3 }
 0x48e   :  { %vm685_vm4 = vcmp.ge.f32.partialorder %v661_v39, 0.0  ;;  %v693_v40 = vmul.f32 0.2, %v661_v39 }
 0x490   :  { %v701_v41 = vsel %vm685_vm4, %v661_v39, %v693_v40 }
 0x491   :  { %v709_v43 = vsel %vm201_vm2, %v701_v41, -1e+30 }
 0x492   :  { %v717_v44 = vsel %vm217_vm3, %v709_v43, -inf }
 0x493   :  { %718 = vmax.xlane.f32.xlu1 %v717_v44 }
 0x495   :  { %v664_v46 = vpop.f32.mrf.mxu3 }
 0x496   :  { %vm686_vm15 = vcmp.ge.f32.partialorder %v664_v46, 0.0  ;;  %v694_v47 = vmul.f32 0.2, %v664_v46 }
 0x498   :  { %v702_v49 = vsel %vm686_vm15, %v664_v46, %v694_v47 }
 0x499   :  { %v710_v50 = vsel %vm202_vm5, %v702_v49, -1e+30 }
 0x49a   :  { %v720_v51 = vsel %vm217_vm3, %v710_v50, -inf }
 0x49b   :  { %721 = vmax.xlane.f32.xlu0 %v720_v51 }
 0x49d   :  { %v667_v52 = vpop.f32.mrf.mxu3 }
 0x49e   :  { %vm687_vm0 = vcmp.ge.f32.partialorder %v667_v52, 0.0  ;;  %v695_v55 = vmul.f32 0.2, %v667_v52 }
 0x4a0   :  { %v703_v56 = vsel %vm687_vm0, %v667_v52, %v695_v55 }
 0x4a1   :  { %v711_v57 = vsel %vm203_vm7, %v703_v56, -1e+30 }
 0x4a2   :  { %v723_v59 = vsel %vm217_vm3, %v711_v57, -inf }
 0x4a3   :  { %724 = vmax.xlane.f32.xlu2 %v723_v59 }
 0x4a5   :  { %v670_v58 = vpop.f32.mrf.mxu3 }
 0x4a6   :  { %vm688_vm2 = vcmp.ge.f32.partialorder %v670_v58, 0.0  ;;  %v696_v62 = vmul.f32 0.2, %v670_v58 }
 0x4a8   :  { %v704_v63 = vsel %vm688_vm2, %v670_v58, %v696_v62 }
 0x4a9   :  { %v712_v9 = vsel %vm204_vm9, %v704_v63, -1e+30 }
 0x4aa   :  { %v726_v11 = vsel %vm217_vm3, %v712_v9, -inf }
 0x4ab   :  { %727 = vmax.xlane.f32.xlu1 %v726_v11 }
 0x4ad   :  { %v673_v8 = vpop.f32.mrf.mxu3 }
 0x4ae   :  { %vm689_vm5 = vcmp.ge.f32.partialorder %v673_v8, 0.0  ;;  %v697_v13 = vmul.f32 0.2, %v673_v8 }
 0x4b0   :  { %v705_v16 = vsel %vm689_vm5, %v673_v8, %v697_v13 }
 0x4b1   :  { %v713_v23 = vsel %vm205_vm11, %v705_v16, -1e+30 }
 0x4b2   :  { %v729_v31 = vsel %vm217_vm3, %v713_v23, -inf }
 0x4b3   :  { %730 = vmax.xlane.f32.xlu0 %v729_v31 }
 0x4b5   :  { %v676_v53 = vpop.f32.mrf.mxu3 }
 0x4b6   :  { %vm690_vm7 = vcmp.ge.f32.partialorder %v676_v53, 0.0  ;;  %v698_v18 = vmul.f32 0.2, %v676_v53 }
 0x4b8   :  { %v706_v19 = vsel %vm690_vm7, %v676_v53, %v698_v18 }
 0x4b9   :  { %v714_v25 = vsel %vm206_vm13, %v706_v19, -1e+30 }
 0x4ba   :  { %v732_v0 = vsel %vm217_vm3, %v714_v25, -inf }
 0x4bb   :  { %733 = vmax.xlane.f32.xlu2 %v732_v0 }
 0x4bd   :  { %v679_v27 = vpop.f32.mrf.mxu3 }
 0x4be   :  { %vm691_vm9 = vcmp.ge.f32.partialorder %v679_v27, 0.0  ;;  %v699_v1 = vmul.f32 0.2, %v679_v27 }
 0x4c0   :  { %v707_v4 = vsel %vm691_vm9, %v679_v27, %v699_v1 }
 0x4c1   :  { %v715_v29 = vsel %vm1604_vm8, %v707_v4, -1e+30 }
 0x4c2   :  { %v735_v28 = vsel %vm217_vm3, %v715_v29, -inf }
 0x4c3   :  { %736 = vmax.xlane.f32.xlu1 %v735_v28 }
 0x4c5   :  { %v682_v2 = vpop.f32.mrf.mxu3 }
 0x4c6   :  { %vm692_vm11 = vcmp.ge.f32.partialorder %v682_v2, 0.0  ;;  %v700_v5 = vmul.f32 0.2, %v682_v2 }
 0x4c8   :  { %v708_v12 = vsel %vm692_vm11, %v682_v2, %v700_v5 }
 0x4c9   :  { %v716_v6 = vsel %vm1605_vm10, %v708_v12, -1e+30 }
 0x4ca   :  { %v738_v15 = vsel %vm217_vm3, %v716_v6, -inf }
 0x4cb   :  { %739 = vmax.xlane.f32.xlu0 %v738_v15 }
 0x506   :  { %v719_v7 = vpop.xlane.xlu1 %718 }
 0x507   :  { %v741_v32 = vsub.f32 %v709_v43, %v719_v7 }
 0x509   :  { %v749_v33 = vmul.f32 1.442695, %v741_v32 }
 0x50b   :  { %1111 = vpow2.f32 %v749_v33 }
 0x50e   :  { %v722_v38 = vpop.xlane.xlu0 %721 }
 0x50f   :  { %v742_v34 = vsub.f32 %v710_v50, %v722_v38 }
 0x511   :  { %v1112_v45 = vpop.eup %1111  ;;  %v751_v35 = vmul.f32 1.442695, %v742_v34 }
 0x512   :  { %v1501_v37 = vmul.f32 %v1112_v45, %v1279_v24 }
 0x513   :  { %1113 = vpow2.f32 %v751_v35 }
 0x514   :  { %v773_v39 = vsel %vm217_vm3, %v1501_v37, 0.0 }
 0x515   :  { %774 = vadd.xlane.f32.xlu2 %v773_v39 }
 0x516   :  { %v725_v40 = vpop.xlane.xlu2 %724 }
 0x517   :  { %v743_v41 = vsub.f32 %v711_v57, %v725_v40 }
 0x519   :  { %v1114_v44 = vpop.eup %1113  ;;  %v753_v46 = vmul.f32 1.442695, %v743_v41 }
 0x51a   :  { %v1506_v43 = vmul.f32 %v1114_v44, %v1288_v30 }
 0x51b   :  { %1115 = vpow2.f32 %v753_v46 }
 0x51c   :  { %v776_v47 = vsel %vm217_vm3, %v1506_v43, 0.0 }
 0x51d   :  { %777 = vadd.xlane.f32.xlu1 %v776_v47 }
 0x51e   :  { %v728_v49 = vpop.xlane.xlu1 %727 }
 0x51f   :  { %v744_v24 = vsub.f32 %v712_v9, %v728_v49 }
 0x521   :  { %v1116_v50 = vpop.eup %1115  ;;  %v755_v51 = vmul.f32 1.442695, %v744_v24 }
 0x522   :  { %v1511_v52 = vmul.f32 %v1116_v50, %v1297_v36 }
 0x523   :  { %1117 = vpow2.f32 %v755_v51 }
 0x524   :  { %v779_v55 = vsel %vm217_vm3, %v1511_v52, 0.0 }
 0x525   :  { %780 = vadd.xlane.f32.xlu0 %v779_v55 }
 0x526   :  { %v731_v56 = vpop.xlane.xlu0 %730 }
 0x527   :  { %v745_v30 = vsub.f32 %v713_v23, %v731_v56 }
 0x529   :  { %v1118_v57 = vpop.eup %1117  ;;  %v757_v59 = vmul.f32 1.442695, %v745_v30 }
 0x52a   :  { %v1516_v58 = vmul.f32 %v1118_v57, %v1306_v42 }
 0x52b   :  { %1119 = vpow2.f32 %v757_v59 }
 0x52c   :  { %v782_v62 = vsel %vm217_vm3, %v1516_v58, 0.0 }
 0x52d   :  { %783 = vadd.xlane.f32.xlu2 %v782_v62 }
 0x52e   :  { %v734_v63 = vpop.xlane.xlu2 %733 }
 0x52f   :  { %v746_v36 = vsub.f32 %v714_v25, %v734_v63 }
 0x531   :  { %v1120_v9 = vpop.eup %1119  ;;  %v759_v11 = vmul.f32 1.442695, %v746_v36 }
 0x532   :  { %v1521_v8 = vmul.f32 %v1120_v9, %v1312_v48 }
 0x533   :  { %1121 = vpow2.f32 %v759_v11 }
 0x534   :  { %v785_v13 = vsel %vm217_vm3, %v1521_v8, 0.0 }
 0x535   :  { %786 = vadd.xlane.f32.xlu1 %v785_v13 }
 0x536   :  { %v737_v16 = vpop.xlane.xlu1 %736 }
 0x537   :  { %v747_v42 = vsub.f32 %v715_v29, %v737_v16 }
 0x539   :  { %v1122_v23 = vpop.eup %1121  ;;  %v761_v31 = vmul.f32 1.442695, %v747_v42 }
 0x53a   :  { %v1526_v53 = vmul.f32 %v1122_v23, %v1318_v54 }
 0x53b   :  { %1123 = vpow2.f32 %v761_v31 }
 0x53c   :  { %v788_v18 = vsel %vm217_vm3, %v1526_v53, 0.0 }
 0x53d   :  { %789 = vadd.xlane.f32.xlu0 %v788_v18 }
 0x53e   :  { %v740_v19 = vpop.xlane.xlu0 %739 }
 0x53f   :  { %v748_v48 = vsub.f32 %v716_v6, %v740_v19 }
 0x541   :  { %v1124_v25 = vpop.eup %1123  ;;  %v763_v0 = vmul.f32 1.442695, %v748_v48 }
 0x542   :  { %v1531_v27 = vmul.f32 %v1124_v25, %v1324_v60 }
 0x543   :  { %1125 = vpow2.f32 %v763_v0 }
 0x544   :  { %v791_v1 = vsel %vm217_vm3, %v1531_v27, 0.0 }
 0x545   :  { %792 = vadd.xlane.f32.xlu2 %v791_v1 }
 0x549   :  { %v1126_v4 = vpop.eup %1125 }
 0x54a   :  { %v1536_v54 = vmul.f32 %v1126_v4, %v1330_v10 }
 0x54c   :  { %v794_v29 = vsel %vm217_vm3, %v1536_v54, 0.0 }
 0x54d   :  { %795 = vadd.xlane.f32.xlu1 %v794_v29 }
 0x551   :  { %933 = vrot.lane.b32.xlu0 %v1433_v22, %s1204_s5 }
 0x559   :  { %939 = vrot.lane.b32.xlu0 %v1429_v20, %s1204_s5 }
 0x55d   :  { %935 = vrot.lane.b32.xlu2 %v1444_v3, %s1204_s5 }
 0x561   :  { %943 = vrot.lane.b32.xlu0 %v1420_v14, %s1204_s5 }
 0x565   :  { %941 = vrot.lane.b32.xlu2 %v1440_v26, %s1204_s5 }
 0x566   :  { %937 = vrot.lane.b32.xlu1 %v1423_v17, %s1204_s5 }
 0x56d   :  { %947 = vrot.lane.b32.xlu2 %v1431_v21, %s1204_s5 }
 0x56e   :  { %945 = vrot.lane.b32.xlu1 %v1425_v61, %s1204_s5 }
 0x588   :  { %v775_v60 = vpop.xlane.xlu2 %774 }
 0x589   :  { %v797_v10 = vmax.f32 %v775_v60, 1e-20 }
 0x58b   :  { %1127 = vrcp.f32 %v797_v10  ;;  %v816_v15 = vand.u32 2147483648, %v797_v10  ;;  %vm810_vm12 = vweird.f32 %v797_v10  ;;  %v814_v61 = vand.u32 2147483647, %v797_v10 }
 0x58d   :  { %v817_v45 = vor.u32 1.1754944e-38, %v816_v15  ;;  %vm815_vm4 = vcmp.eq.f32.partialorder %v814_v61, 8.507059e+37 }
 0x590   :  { %v778_v28 = vpop.xlane.xlu1 %777 }
 0x591   :  { %v1128_v2 = vpop.eup %1127  ;;  %v798_v22 = vmax.f32 %v778_v28, 1e-20 }
 0x592   :  { %v806_v5 = vmul.f32 %v1128_v2, %v797_v10  ;;  %vm811_vm13 = vweird.f32 %v1128_v2 }
 0x593   :  { %1129 = vrcp.f32 %v798_v22  ;;  %vm1548_vm14 = vmor %vm810_vm12, %vm811_vm13  ;;  %v831_v32 = vand.u32 2147483648, %v798_v22  ;;  %v829_v38 = vand.u32 2147483647, %v798_v22  ;;  %vm825_vm6 = vweird.f32 %v798_v22 }
 0x594   :  { %v807_v20 = vsub.f32 1.0, %v806_v5 }
 0x595   :  { %v832_v41 = vor.u32 1.1754944e-38, %v831_v32  ;;  %vm830_vm0 = vcmp.eq.f32.partialorder %v829_v38, 8.507059e+37 }
 0x596   :  { %v808_v3 = vmul.f32 %v1128_v2, %v807_v20 }
 0x598   :  { %v781_v12 = vpop.xlane.xlu0 %780  ;;  %v809_v17 = vadd.f32 %v1128_v2, %v808_v3 }
 0x599   :  { %v1130_v14 = vpop.eup %1129  ;;  %v799_v6 = vmax.f32 %v781_v12, 1e-20 }
 0x59a   :  { %v821_v26 = vmul.f32 %v1130_v14, %v798_v22  ;;  %vm826_vm1 = vweird.f32 %v1130_v14  ;;  %v813_v34 = vsel %vm1548_vm14, %v1128_v2, %v809_v17 }
 0x59b   :  { %1131 = vrcp.f32 %v799_v6  ;;  %vm827_vm15 = vmor %vm825_vm6, %vm826_vm1  ;;  %v818_v46 = vsel %vm815_vm4, %v817_v45, %v813_v34  ;;  %v846_v9 = vand.u32 2147483648, %v799_v6  ;;  %vm840_vm5 = vweird.f32 %v799_v6 }
 0x59c   :  { %v822_v21 = vsub.f32 1.0, %v821_v26  ;;  %v819_v51 = vmul.f32 %v818_v46, %v1501_v37  ;;  %v844_v13 = vand.u32 2147483647, %v799_v6 }
 0x59d   :  { %v847_v23 = vor.u32 1.1754944e-38, %v846_v9 }
 0x59e   :  { %v823_v33 = vmul.f32 %v1130_v14, %v822_v21  ;;  %vm845_vm8 = vcmp.eq.f32.partialorder %v844_v13, 8.507059e+37 }
 0x5a0   :  { %v784_v35 = vpop.xlane.xlu2 %783  ;;  %v824_v39 = vadd.f32 %v1130_v14, %v823_v33 }
 0x5a1   :  { %v1132_v40 = vpop.eup %1131  ;;  %v800_v44 = vmax.f32 %v784_v35, 1e-20 }
 0x5a2   :  { %v836_v47 = vmul.f32 %v1132_v40, %v799_v6  ;;  %v828_v49 = vsel %vm827_vm15, %v1130_v14, %v824_v39  ;;  %vm841_vm2 = vweird.f32 %v1132_v40 }
 0x5a3   :  { %1133 = vrcp.f32 %v800_v44  ;;  %v833_v24 = vsel %vm830_vm0, %v832_v41, %v828_v49  ;;  %vm842_vm7 = vmor %vm840_vm5, %vm841_vm2  ;;  %v861_v16 = vand.u32 2147483648, %v800_v44  ;;  %vm855_vm11 = vweird.f32 %v800_v44 }
 0x5a4   :  { %v837_v50 = vsub.f32 1.0, %v836_v47  ;;  %v834_v55 = vmul.f32 %v833_v24, %v1506_v43  ;;  %v859_v43 = vand.u32 2147483647, %v800_v44 }
 0x5a5   :  { %v862_v0 = vor.u32 1.1754944e-38, %v861_v16 }
 0x5a6   :  { %v838_v56 = vmul.f32 %v1132_v40, %v837_v50  ;;  %v925_v30 = vpack.c.bf16 %v834_v55, %v819_v51  ;;  %vm860_vm13 = vcmp.eq.f32.partialorder %v859_v43, 8.507059e+37 }
 0x5a8   :  { %1061 = vmatmul.msk.bf16.vlgmr.msrb.gmra.mxu2 %vm217_vm3, %v925_v30  ;;  %v787_v57 = vpop.xlane.xlu1 %786  ;;  %v839_v36 = vadd.f32 %v1132_v40, %v838_v56 }
 0x5a9   :  { %v1134_v59 = vpop.eup %1133  ;;  %v801_v62 = vmax.f32 %v787_v57, 1e-20 }
 0x5aa   :  { %v851_v63 = vmul.f32 %v1134_v59, %v800_v44  ;;  %v843_v42 = vsel %vm842_vm7, %v1132_v40, %v839_v36  ;;  %vm856_vm9 = vweird.f32 %v1134_v59 }
 0x5ab   :  { %1135 = vrcp.f32 %v801_v62  ;;  %v848_v25 = vsel %vm845_vm8, %v847_v23, %v843_v42  ;;  %vm857_vm10 = vmor %vm855_vm11, %vm856_vm9  ;;  %v876_v6 = vand.u32 2147483648, %v801_v62  ;;  %vm870_vm14 = vweird.f32 %v801_v62 }
 0x5ac   :  { %v852_v11 = vsub.f32 1.0, %v851_v63  ;;  %v849_v10 = vmul.f32 %v848_v25, %v1511_v52  ;;  %v874_v17 = vand.u32 2147483647, %v801_v62 }
 0x5ad   :  { %v877_v21 = vor.u32 1.1754944e-38, %v876_v6 }
 0x5ae   :  { %v853_v37 = vmul.f32 %v1134_v59, %v852_v11  ;;  %vm875_vm4 = vcmp.eq.f32.partialorder %v874_v17, 8.507059e+37 }
 0x5b0   :  { %v790_v31 = vpop.xlane.xlu0 %789  ;;  %v854_v18 = vadd.f32 %v1134_v59, %v853_v37 }
 0x5b1   :  { %v1136_v19 = vpop.eup %1135  ;;  %v802_v48 = vmax.f32 %v790_v31, 1e-20 }
 0x5b2   :  { %v866_v1 = vmul.f32 %v1136_v19, %v801_v62  ;;  %v858_v4 = vsel %vm857_vm10, %v1134_v59, %v854_v18  ;;  %vm871_vm12 = vweird.f32 %v1136_v19 }
 0x5b3   :  { %1137 = vrcp.f32 %v802_v48  ;;  %v863_v29 = vsel %vm860_vm13, %v862_v0, %v858_v4  ;;  %vm872_vm1 = vmor %vm870_vm14, %vm871_vm12  ;;  %v891_v15 = vand.u32 2147483648, %v802_v48  ;;  %vm885_vm15 = vweird.f32 %v802_v48 }
 0x5b4   :  { %v867_v60 = vsub.f32 1.0, %v866_v1  ;;  %v864_v28 = vmul.f32 %v863_v29, %v1516_v58  ;;  %v889_v58 = vand.u32 2147483647, %v802_v48  ;;  %vm998_vm14 = vcmask 64512  }
 0x5b5   :  { %v892_v45 = vor.u32 1.1754944e-38, %v891_v15 }
 0x5b6   :  { %v868_v2 = vmul.f32 %v1136_v19, %v867_v60  ;;  %v926_v22 = vpack.c.bf16 %v864_v28, %v849_v10  ;;  %vm890_vm2 = vcmp.eq.f32.partialorder %v889_v58, 8.507059e+37 }
 0x5b8   :  { %v793_v5 = vpop.xlane.xlu2 %792  ;;  %1062 = vmatmul.msk.bf16.gmra.mxu2 %vm217_vm3, %v926_v22  ;;  %v869_v14 = vadd.f32 %v1136_v19, %v868_v2 }
 0x5b9   :  { %v1138_v20 = vpop.eup %1137  ;;  %v803_v3 = vmax.f32 %v793_v5, 1e-20 }
 0x5ba   :  { %v881_v12 = vmul.f32 %v1138_v20, %v802_v48  ;;  %v873_v61 = vsel %vm872_vm1, %v1136_v19, %v869_v14  ;;  %vm886_vm6 = vweird.f32 %v1138_v20 }
 0x5bb   :  { %1139 = vrcp.f32 %v803_v3  ;;  %v878_v34 = vsel %vm875_vm4, %v877_v21, %v873_v61  ;;  %vm887_vm0 = vmor %vm885_vm15, %vm886_vm6  ;;  %v906_v55 = vand.u32 2147483648, %v803_v3  ;;  %vm900_vm7 = vweird.f32 %v803_v3 }
 0x5bc   :  { %v882_v26 = vsub.f32 1.0, %v881_v12  ;;  %v879_v44 = vmul.f32 %v878_v34, %v1521_v8  ;;  %v904_v30 = vand.u32 2147483647, %v803_v3 }
 0x5bd   :  { %v907_v63 = vor.u32 1.1754944e-38, %v906_v55 }
 0x5be   :  { %v883_v52 = vmul.f32 %v1138_v20, %v882_v26  ;;  %vm905_vm11 = vcmp.eq.f32.partialorder %v904_v30, 8.507059e+37 }
 0x5c0   :  { %v796_v7 = vpop.xlane.xlu1 %795  ;;  %v884_v32 = vadd.f32 %v1138_v20, %v883_v52  ;;  %v936_v18 = vpop.permute.xlu2 %935 }
 0x5c1   :  { %v1140_v33 = vpop.eup %1139  ;;  %v804_v38 = vmax.f32 %v796_v7, 1e-20 }
 0x5c2   :  { %v896_v35 = vmul.f32 %v1140_v33, %v803_v3  ;;  %v888_v39 = vsel %vm887_vm0, %v1138_v20, %v884_v32  ;;  %vm901_vm5 = vweird.f32 %v1140_v33 }
 0x5c3   :  { %1141 = vrcp.f32 %v804_v38  ;;  %v893_v40 = vsel %vm890_vm2, %v892_v45, %v888_v39  ;;  %vm902_vm9 = vmor %vm900_vm7, %vm901_vm5  ;;  %v921_v57 = vand.u32 2147483648, %v804_v38  ;;  %v919_v8 = vand.u32 2147483647, %v804_v38  ;;  %v934_v43 = vpop.permute.xlu0 %933 }
 0x5c4   :  { %v897_v41 = vsub.f32 1.0, %v896_v35  ;;  %v894_v46 = vmul.f32 %v893_v40, %v1526_v53  ;;  %vm915_vm10 = vweird.f32 %v804_v38 }
 0x5c5   :  { %v922_v9 = vor.u32 1.1754944e-38, %v921_v57  ;;  %vm920_vm12 = vcmp.eq.f32.partialorder %v919_v8, 8.507059e+37 }
 0x5c6   :  { %v898_v47 = vmul.f32 %v1140_v33, %v897_v41  ;;  %v927_v49 = vpack.c.bf16 %v894_v46, %v879_v44 }
 0x5c8   :  { %1063 = vmatmul.msk.bf16.gmra.mxu2 %vm217_vm3, %v927_v49  ;;  %v899_v51 = vadd.f32 %v1140_v33, %v898_v47  ;;  %v942_v29 = vpop.permute.xlu2 %941 }
 0x5c9   :  { %v1142_v24 = vpop.eup %1141 }
 0x5ca   :  { %v911_v50 = vmul.f32 %v1142_v24, %v804_v38  ;;  %v903_v62 = vsel %vm902_vm9, %v1140_v33, %v899_v51  ;;  %vm916_vm8 = vweird.f32 %v1142_v24 }
 0x5cb   :  { %v908_v36 = vsel %vm905_vm11, %v907_v63, %v903_v62  ;;  %vm917_vm13 = vmor %vm915_vm10, %vm916_vm8  ;;  %v940_v0 = vpop.permute.xlu0 %939 }
 0x5cc   :  { %v912_v56 = vsub.f32 1.0, %v911_v50  ;;  %v909_v16 = vmul.f32 %v908_v36, %v1531_v27 }
 0x5ce   :  { %v913_v59 = vmul.f32 %v1142_v24, %v912_v56 }
 0x5d0   :  { %v914_v53 = vadd.f32 %v1142_v24, %v913_v59  ;;  %v948_v12 = vpop.permute.xlu2 %947 }
 0x5d2   :  { %v918_v11 = vsel %vm917_vm13, %v1142_v24, %v914_v53 }
 0x5d3   :  { %v923_v13 = vsel %vm920_vm12, %v922_v9, %v918_v11  ;;  %v944_v28 = vpop.permute.xlu0 %943 }
 0x5d4   :  { %v924_v37 = vmul.f32 %v923_v13, %v1536_v54 }
 0x5d6   :  { %v928_v42 = vpack.c.bf16 %v924_v37, %v909_v16 }
 0x5d8   :  { %1064 = vmatmul.msk.bf16.gmra.mxu2 %vm217_vm3, %v928_v42  ;;  %v938_v27 = vpop.permute.xlu1 %937 }
 0x5e0   :  { %v946_v5 = vpop.permute.xlu1 %945 }
 0x62b   :  { %v978_v23 = vpop.f32.mrf.mxu2 }
 0x62c   :  { %v979_v31 = vadd.f32 %v978_v23, %v934_v43 }
 0x62e   :  { %999 = vst.msk [vmem:[%s1601_s3] sm:$0xff] %vm998_vm14, %v979_v31 }
 0x633   :  { %v980_v19 = vpop.f32.mrf.mxu2 }
 0x634   :  { %v981_v48 = vadd.f32 %v980_v19, %v936_v18 }
 0x636   :  { %1000 = vst.msk [vmem:[%s1601_s3 + $0x8] sm:$0xff] %vm998_vm14, %v981_v48 }
 0x63b   :  { %v983_v54 = vpop.f32.mrf.mxu2 }
 0x63c   :  { %v984_v25 = vadd.f32 %v983_v54, %v938_v27 }
 0x63e   :  { %1001 = vst.msk [vmem:[%s1601_s3 + $0x10] sm:$0xff] %vm998_vm14, %v984_v25 }
 0x643   :  { %v985_v1 = vpop.f32.mrf.mxu2 }
 0x644   :  { %v986_v4 = vadd.f32 %v985_v1, %v940_v0 }
 0x646   :  { %1002 = vst.msk [vmem:[%s1601_s3 + $0x18] sm:$0xff] %vm998_vm14, %v986_v4 }
 0x64b   :  { %v988_v60 = vpop.f32.mrf.mxu2 }
 0x64c   :  { %v989_v10 = vadd.f32 %v988_v60, %v942_v29 }
 0x64e   :  { %1003 = vst.msk [vmem:[%s1601_s3 + $0x20] sm:$0xff] %vm998_vm14, %v989_v10 }
 0x653   :  { %v990_v2 = vpop.f32.mrf.mxu2 }
 0x654   :  { %v991_v22 = vadd.f32 %v990_v2, %v944_v28 }
 0x656   :  { %1004 = vst.msk [vmem:[%s1601_s3 + $0x28] sm:$0xff] %vm998_vm14, %v991_v22 }
 0x65b   :  { %v993_v20 = vpop.f32.mrf.mxu2 }
 0x65c   :  { %v994_v3 = vadd.f32 %v993_v20, %v946_v5 }
 0x65e   :  { %1005 = vst.msk [vmem:[%s1601_s3 + $0x30] sm:$0xff] %vm998_vm14, %v994_v3 }
 0x663   :  { %v995_v14 = vpop.f32.mrf.mxu2 }
 0x664   :  { %v996_v6 = vadd.f32 %v995_v14, %v948_v12 }
 0x666   :  { %1006 = vst.msk [vmem:[%s1601_s3 + $0x38] sm:$0xff] %vm998_vm14, %v996_v6 }
 0x667   :  { %1011 = vsyncpa [#allocation3], 1 }
 0x668   :  { %1012 = vsyncpa [#allocation5], 1 }

</bundles_post_ra>
